<compile_context>
chip_gen: v7x
topology: tpu7x:2x2x1
jax: 0.10.0
libtpu: 0.0.40
codegen_flags: <defaults>
</compile_context>

<pallas_src>
import functools

import jax
import jax.numpy as jnp
from jax import lax
from jax.experimental import pallas as pl
from jax.experimental.pallas import tpu as pltpu

BN_EPS = 1e-5    # torch.nn.BatchNorm1d default
L2_EPS = 1e-12   # torch.nn.functional.normalize default


def _bn_train(h, gamma, beta, b_valid, b_pad):
    """Training-mode BatchNorm1d (biased batch stats), per group.

    h: (G, Bp, E) fp32; stats over axis=1 using only the first b_valid rows
    (padded rows masked out). gamma/beta: (1, E) fp32 (broadcast).
    """
    if b_valid == b_pad:
        mu = jnp.mean(h, axis=1, keepdims=True)
        var = jnp.mean((h - mu) ** 2, axis=1, keepdims=True)
    else:
        mask = (lax.broadcasted_iota(jnp.int32, h.shape, 1) < b_valid).astype(
            jnp.float32)
        inv_n = 1.0 / float(b_valid)
        mu = jnp.sum(h * mask, axis=1, keepdims=True) * inv_n
        var = jnp.sum(((h - mu) * mask) ** 2, axis=1, keepdims=True) * inv_n
    return (h - mu) * lax.rsqrt(var + BN_EPS) * gamma + beta


def _mlp_head_kernel(x_ref, w1_ref, w2_ref, bn_ref, o_ref, *,
                     n_groups, b_valid, b_pad):
    # x_ref : (G*Bp, 2048) bf16  -- all clip groups stacked along rows
    # w1_ref: (2048, E) bf16, w2_ref: (E, E) bf16
    # bn_ref: (8, E) fp32 -- rows 0..3 = bn1.gamma, bn1.beta, bn2.gamma, bn2.beta
    # o_ref : (G*Bp, E) fp32
    E = w2_ref.shape[1]

    g1, be1 = bn_ref[0:1, :], bn_ref[1:2, :]
    g2, be2 = bn_ref[2:3, :], bn_ref[3:4, :]

    # fc1: one MXU matmul over all groups (fc1 bias omitted -- absorbed by BN).
    h = jnp.dot(x_ref[...], w1_ref[...], preferred_element_type=jnp.float32)

    # bn1 (per-group batch stats over valid rows) + relu.
    h = h.reshape(n_groups, b_pad, E)
    h = jnp.maximum(_bn_train(h, g1, be1, b_valid, b_pad), 0.0)

    # fc2 (no bias), again one matmul over all groups.
    z = jnp.dot(h.reshape(n_groups * b_pad, E).astype(jnp.bfloat16),
                w2_ref[...], preferred_element_type=jnp.float32)

    # bn2 (per-group batch stats).
    z = _bn_train(z.reshape(n_groups, b_pad, E), g2, be2, b_valid, b_pad)

    # F.normalize(p=2, dim=1): z / max(||z||, eps) == z * rsqrt(max(||z||^2, eps^2))
    sumsq = jnp.sum(z * z, axis=2, keepdims=True)
    z = z * lax.rsqrt(jnp.maximum(sumsq, L2_EPS * L2_EPS))

    o_ref[...] = z.reshape(n_groups * b_pad, E)


def _mlp_heads(x2d, params, *, n_groups, b_valid, b_pad):
    """x2d: (G*Bp, 2048) bf16 -> (G*Bp, E) fp32, one fused grid-free pallas_call."""
    GB, C = x2d.shape
    E = params["w1"].shape[1]

    kernel = functools.partial(_mlp_head_kernel, n_groups=n_groups,
                               b_valid=b_valid, b_pad=b_pad)

    cost = pl.CostEstimate(
        flops=int(2 * GB * C * E + 2 * GB * E * E),
        transcendentals=int(3 * GB + 2 * n_groups * E),
        bytes_accessed=int(x2d.size * 2 + params["w1"].size * 2
                           + params["w2"].size * 2 + params["bn"].size * 4
                           + GB * E * 4),
    )

    vmem = pl.BlockSpec(memory_space=pltpu.MemorySpace.VMEM)
    return pl.pallas_call(
        kernel,
        out_shape=jax.ShapeDtypeStruct((GB, E), jnp.float32),
        in_specs=[vmem, vmem, vmem, vmem],
        out_specs=vmem,
        cost_estimate=cost,
    )(x2d, params["w1"], params["w2"], params["bn"])


def init_params(key, final_embedding_size=128):
    """Deterministic synthetic parameters matching mlp_r50.__init__ shapes.

    fc1/fc2 weights are stored transposed (in, out) and pre-cast to bf16 so no
    per-forward cast is needed. BN affine params are packed into one (8, E)
    fp32 array (rows: bn1.weight, bn1.bias, bn2.weight, bn2.bias, 4 pad rows).
    """
    E = final_embedding_size
    k1, k2 = jax.random.split(key, 2)
    w1 = (jax.random.normal(k1, (2048, E), dtype=jnp.float32) * 0.02
          ).astype(jnp.bfloat16)
    w2 = (jax.random.normal(k2, (E, E), dtype=jnp.float32) * 0.05
          ).astype(jnp.bfloat16)
    bn = jnp.concatenate([
        jnp.ones((1, E), jnp.float32),    # bn1.weight
        jnp.zeros((1, E), jnp.float32),   # bn1.bias
        jnp.ones((1, E), jnp.float32),    # bn2.weight
        jnp.zeros((1, E), jnp.float32),   # bn2.bias
        jnp.zeros((4, E), jnp.float32),   # pad to a full (8, E) tile
    ], axis=0)
    # fc1.bias exists in the PyTorch module but is a mathematical no-op under
    # train-mode BatchNorm (batch mean absorbs it); kept only for parity.
    b1 = jnp.zeros((1, E), dtype=jnp.float32)
    return dict(w1=w1, w2=w2, bn=bn, b1=b1)


@functools.partial(jax.jit, static_argnames=("clip_type",))
def _forward_impl(x, params, *, clip_type):
    if x.shape[0] == 1:
        x = jnp.tile(x, (2, 1, 1, 1, 1))
    B = x.shape[0]
    Bp = max(8, ((B + 7) // 8) * 8)          # sublane-aligned per-group rows

    xa = jnp.mean(x, axis=2).reshape(B, -1)  # temp_avg + flatten(1): (B, 2048)
    if clip_type == 'd':
        stacked = xa[None]                                       # (1, B, 2048)
    else:
        xf = jnp.moveaxis(x[:, :, :4, :, :], 2, 0).reshape(4, B, -1)
        stacked = jnp.concatenate([xa[None], xf], axis=0)        # (5, B, 2048)
    G = stacked.shape[0]
    if Bp != B:
        stacked = jnp.pad(stacked, ((0, 0), (0, Bp - B), (0, 0)))
    x2d = stacked.reshape(G * Bp, -1).astype(jnp.bfloat16)

    out = _mlp_heads(x2d, params, n_groups=G, b_valid=B, b_pad=Bp)
    out = out.reshape(G, Bp, -1)[:, :B]                          # (G, B, E)
    if clip_type == 'd':
        return out[0]
    return tuple(out[g] for g in range(G))


def mlp_r50_forward(x, clip_type, params):
    """Mirrors mlp_r50.forward((x, clip_type)). x: (B, 2048, T, 1, 1) fp32."""
    if clip_type not in ('d', 's'):
        return (None, None, None, None, None)
    return _forward_impl(x, params, clip_type=clip_type)


if __name__ == "__main__":
    key = jax.random.PRNGKey(0)
    kx, kp = jax.random.split(key)

    B, C, T, H, W = 2, 2048, 4, 1, 1          # C*H*W must equal 2048 (fc1 input)
    x = jax.random.normal(kx, (B, C, T, H, W), dtype=jnp.float32)
    params = init_params(kp, final_embedding_size=128)

    # 'd' clip path (single group)
    out_d = mlp_r50_forward(x, 'd', params)
    jax.block_until_ready(out_d)
    assert out_d.shape == (B, 128)

    # 's' clip path (avg-pooled + 4 frames, all in one fused call)
    out_s = mlp_r50_forward(x, 's', params)
    jax.block_until_ready(out_s)
    assert all(o.shape == (B, 128) for o in out_s)

    # embeddings are L2-normalized
    assert jnp.allclose(jnp.linalg.norm(out_d, axis=1), 1.0, atol=1e-3)
    assert jnp.allclose(jnp.linalg.norm(out_s[1], axis=1), 1.0, atol=1e-3)

    print("KERNEL_OK")
</pallas_src>

<mosaic_0001>
module attributes {stable_mosaic.version = 11 : i64} {
  func.func @_mlp_head_kernel(%arg0: memref<8x2048xbf16, #tpu.memory_space<vmem>>, %arg1: memref<2048x128xbf16, #tpu.memory_space<vmem>>, %arg2: memref<128x128xbf16, #tpu.memory_space<vmem>>, %arg3: memref<8x128xf32, #tpu.memory_space<vmem>>, %arg4: memref<8x128xf32, #tpu.memory_space<vmem>>) attributes {dimension_semantics = [], scalar_prefetch = 0 : i64, scratch_operands = 0 : i64, tpu.core_type = #tpu.core_type<tc>} {
    %c0 = arith.constant 0 : index
    %c0_0 = arith.constant 0 : index
    %0 = vector.load %arg3[%c0, %c0_0] : memref<8x128xf32, #tpu.memory_space<vmem>>, vector<1x128xf32>
    %c1 = arith.constant 1 : index
    %c0_1 = arith.constant 0 : index
    %1 = vector.load %arg3[%c1, %c0_1] : memref<8x128xf32, #tpu.memory_space<vmem>>, vector<1x128xf32>
    %c2 = arith.constant 2 : index
    %c0_2 = arith.constant 0 : index
    %2 = vector.load %arg3[%c2, %c0_2] : memref<8x128xf32, #tpu.memory_space<vmem>>, vector<1x128xf32>
    %c3 = arith.constant 3 : index
    %c0_3 = arith.constant 0 : index
    %3 = vector.load %arg3[%c3, %c0_3] : memref<8x128xf32, #tpu.memory_space<vmem>>, vector<1x128xf32>
    %c0_4 = arith.constant 0 : index
    %c0_5 = arith.constant 0 : index
    %4 = vector.load %arg0[%c0_4, %c0_5] : memref<8x2048xbf16, #tpu.memory_space<vmem>>, vector<8x2048xbf16>
    %c0_6 = arith.constant 0 : index
    %c0_7 = arith.constant 0 : index
    %5 = vector.load %arg1[%c0_6, %c0_7] : memref<2048x128xbf16, #tpu.memory_space<vmem>>, vector<2048x128xbf16>
    %cst = arith.constant dense<0.000000e+00> : vector<8x128xf32>
    %6 = tpu.matmul %4, %5, %cst {dimension_numbers = #tpu.dot_dimension_numbers<[1], [0], [0], [1], [0, 0, 1, 1], [], []>} : vector<8x2048xbf16>, vector<2048x128xbf16>, vector<8x128xf32> -> vector<8x128xf32>
    %7 = vector.shape_cast %6 : vector<8x128xf32> to vector<1x8x128xf32>
    %8 = tpu.iota {dimensions = array<i32: 1>} : vector<1x8x128xi32>
    %c2_i32 = arith.constant 2 : i32
    %9 = vector.broadcast %c2_i32 : i32 to vector<1x8x128xi32>
    %10 = arith.cmpi slt, %8, %9 : vector<1x8x128xi32>
    %11 = arith.extui %10 : vector<1x8x128xi1> to vector<1x8x128xi32>
    %12 = arith.sitofp %11 : vector<1x8x128xi32> to vector<1x8x128xf32>
    %13 = arith.mulf %7, %12 : vector<1x8x128xf32>
    %cst_8 = arith.constant dense<0.000000e+00> : vector<1x128xf32>
    %14 = vector.multi_reduction <add>, %13, %cst_8 [1] : vector<1x8x128xf32> to vector<1x128xf32>
    %15 = vector.shape_cast %14 : vector<1x128xf32> to vector<1x1x128xf32>
    %cst_9 = arith.constant 5.000000e-01 : f32
    %16 = vector.broadcast %cst_9 : f32 to vector<1x1x128xf32>
    %17 = arith.mulf %15, %16 : vector<1x1x128xf32>
    %18 = vector.broadcast %17 : vector<1x1x128xf32> to vector<1x8x128xf32>
    %19 = arith.subf %7, %18 : vector<1x8x128xf32>
    %20 = arith.mulf %19, %12 : vector<1x8x128xf32>
    %21 = arith.mulf %20, %20 : vector<1x8x128xf32>
    %cst_10 = arith.constant dense<0.000000e+00> : vector<1x128xf32>
    %22 = vector.multi_reduction <add>, %21, %cst_10 [1] : vector<1x8x128xf32> to vector<1x128xf32>
    %23 = vector.shape_cast %22 : vector<1x128xf32> to vector<1x1x128xf32>
    %cst_11 = arith.constant 5.000000e-01 : f32
    %24 = vector.broadcast %cst_11 : f32 to vector<1x1x128xf32>
    %25 = arith.mulf %23, %24 : vector<1x1x128xf32>
    %26 = vector.broadcast %17 : vector<1x1x128xf32> to vector<1x8x128xf32>
    %27 = arith.subf %7, %26 : vector<1x8x128xf32>
    %cst_12 = arith.constant 9.99999974E-6 : f32
    %28 = vector.broadcast %cst_12 : f32 to vector<1x1x128xf32>
    %29 = arith.addf %25, %28 : vector<1x1x128xf32>
    %30 = math.rsqrt %29 : vector<1x1x128xf32>
    %31 = vector.broadcast %30 : vector<1x1x128xf32> to vector<1x8x128xf32>
    %32 = arith.mulf %27, %31 : vector<1x8x128xf32>
    %33 = vector.shape_cast %0 : vector<1x128xf32> to vector<1x1x128xf32>
    %34 = vector.broadcast %33 : vector<1x1x128xf32> to vector<1x8x128xf32>
    %35 = arith.mulf %32, %34 : vector<1x8x128xf32>
    %36 = vector.shape_cast %1 : vector<1x128xf32> to vector<1x1x128xf32>
    %37 = vector.broadcast %36 : vector<1x1x128xf32> to vector<1x8x128xf32>
    %38 = arith.addf %35, %37 : vector<1x8x128xf32>
    %cst_13 = arith.constant 0.000000e+00 : f32
    %39 = vector.broadcast %cst_13 : f32 to vector<1x8x128xf32>
    %40 = arith.maximumf %38, %39 : vector<1x8x128xf32>
    %41 = vector.shape_cast %40 : vector<1x8x128xf32> to vector<8x128xf32>
    %42 = arith.truncf %41 : vector<8x128xf32> to vector<8x128xbf16>
    %c0_14 = arith.constant 0 : index
    %c0_15 = arith.constant 0 : index
    %43 = vector.load %arg2[%c0_14, %c0_15] : memref<128x128xbf16, #tpu.memory_space<vmem>>, vector<128x128xbf16>
    %cst_16 = arith.constant dense<0.000000e+00> : vector<8x128xf32>
    %44 = tpu.matmul %42, %43, %cst_16 {dimension_numbers = #tpu.dot_dimension_numbers<[1], [0], [0], [1], [0, 0, 1, 1], [], []>} : vector<8x128xbf16>, vector<128x128xbf16>, vector<8x128xf32> -> vector<8x128xf32>
    %45 = vector.shape_cast %44 : vector<8x128xf32> to vector<1x8x128xf32>
    %46 = tpu.iota {dimensions = array<i32: 1>} : vector<1x8x128xi32>
    %c2_i32_17 = arith.constant 2 : i32
    %47 = vector.broadcast %c2_i32_17 : i32 to vector<1x8x128xi32>
    %48 = arith.cmpi slt, %46, %47 : vector<1x8x128xi32>
    %49 = arith.extui %48 : vector<1x8x128xi1> to vector<1x8x128xi32>
    %50 = arith.sitofp %49 : vector<1x8x128xi32> to vector<1x8x128xf32>
    %51 = arith.mulf %45, %50 : vector<1x8x128xf32>
    %cst_18 = arith.constant dense<0.000000e+00> : vector<1x128xf32>
    %52 = vector.multi_reduction <add>, %51, %cst_18 [1] : vector<1x8x128xf32> to vector<1x128xf32>
    %53 = vector.shape_cast %52 : vector<1x128xf32> to vector<1x1x128xf32>
    %cst_19 = arith.constant 5.000000e-01 : f32
    %54 = vector.broadcast %cst_19 : f32 to vector<1x1x128xf32>
    %55 = arith.mulf %53, %54 : vector<1x1x128xf32>
    %56 = vector.broadcast %55 : vector<1x1x128xf32> to vector<1x8x128xf32>
    %57 = arith.subf %45, %56 : vector<1x8x128xf32>
    %58 = arith.mulf %57, %50 : vector<1x8x128xf32>
    %59 = arith.mulf %58, %58 : vector<1x8x128xf32>
    %cst_20 = arith.constant dense<0.000000e+00> : vector<1x128xf32>
    %60 = vector.multi_reduction <add>, %59, %cst_20 [1] : vector<1x8x128xf32> to vector<1x128xf32>
    %61 = vector.shape_cast %60 : vector<1x128xf32> to vector<1x1x128xf32>
    %cst_21 = arith.constant 5.000000e-01 : f32
    %62 = vector.broadcast %cst_21 : f32 to vector<1x1x128xf32>
    %63 = arith.mulf %61, %62 : vector<1x1x128xf32>
    %64 = vector.broadcast %55 : vector<1x1x128xf32> to vector<1x8x128xf32>
    %65 = arith.subf %45, %64 : vector<1x8x128xf32>
    %cst_22 = arith.constant 9.99999974E-6 : f32
    %66 = vector.broadcast %cst_22 : f32 to vector<1x1x128xf32>
    %67 = arith.addf %63, %66 : vector<1x1x128xf32>
    %68 = math.rsqrt %67 : vector<1x1x128xf32>
    %69 = vector.broadcast %68 : vector<1x1x128xf32> to vector<1x8x128xf32>
    %70 = arith.mulf %65, %69 : vector<1x8x128xf32>
    %71 = vector.shape_cast %2 : vector<1x128xf32> to vector<1x1x128xf32>
    %72 = vector.broadcast %71 : vector<1x1x128xf32> to vector<1x8x128xf32>
    %73 = arith.mulf %70, %72 : vector<1x8x128xf32>
    %74 = vector.shape_cast %3 : vector<1x128xf32> to vector<1x1x128xf32>
    %75 = vector.broadcast %74 : vector<1x1x128xf32> to vector<1x8x128xf32>
    %76 = arith.addf %73, %75 : vector<1x8x128xf32>
    %77 = arith.mulf %76, %76 : vector<1x8x128xf32>
    %cst_23 = arith.constant dense<0.000000e+00> : vector<1x8xf32>
    %78 = vector.multi_reduction <add>, %77, %cst_23 [2] : vector<1x8x128xf32> to vector<1x8xf32>
    %79 = vector.shape_cast %78 : vector<1x8xf32> to vector<1x8x1xf32>
    %cst_24 = arith.constant 1.000000e-24 : f32
    %80 = vector.broadcast %cst_24 : f32 to vector<1x8x1xf32>
    %81 = arith.maximumf %79, %80 : vector<1x8x1xf32>
    %82 = math.rsqrt %81 : vector<1x8x1xf32>
    %83 = vector.broadcast %82 : vector<1x8x1xf32> to vector<1x8x128xf32>
    %84 = arith.mulf %76, %83 : vector<1x8x128xf32>
    %85 = vector.shape_cast %84 : vector<1x8x128xf32> to vector<8x128xf32>
    %c0_25 = arith.constant 0 : index
    %c0_26 = arith.constant 0 : index
    %86 = vector.load %arg4[%c0_25, %c0_26] : memref<8x128xf32, #tpu.memory_space<vmem>>, vector<8x128xf32>
    tpu.vector_store %arg4[%c0_25, %c0_26], %85 {strides = array<i32>} : memref<8x128xf32, #tpu.memory_space<vmem>>, vector<8x128xf32>,
    return
  }
}

</mosaic_0001>

<bundles_post_ra>
// kernel: _forward_impl.1
= control target key start
LH: loop header
LB: loop body
LE: loop exit
PB: predicated region body
PF: predicated region fallthrough
CT: control target
= control target key end

     0   :  { %9 = vsyncpa [#allocation3], 0  ;;  %s2178_s15 = smov [#allocation2]   ;;  %s2293_s0 = inlined_call_operand.vmem [shape: bf16[8,2048], index: 0, kind: input, shape index: {}]   ;;  %s2294_s1 = inlined_call_operand.hbm [shape: bf16[2048,128], index: 1, kind: input, shape index: {}]   ;;  %s2295_s2 = inlined_call_operand.vmem [shape: bf16[128,128], index: 2, kind: input, shape index: {}]   ;;  %s2296_s3 = inlined_call_operand.vmem [shape: f32[8,128], index: 3, kind: input, shape index: {}]   ;;  %s2297_s4 = inlined_call_operand.vmem [shape: f32[8,128], index: 4, kind: output, shape index: {}]  }
   0x1   :  { %s17_s16 = sshll.u32 %s2178_s15, 4  ;;  %s2154_s19 = scalar_lea.hbm %s2294_s1, 16384  ;;  %s18_s16 = int_to_ptr.vmem [resolvable:$true] %s17_s16 }
   0x2   :  { %p2155_p0 = scmp.ne.s32.totalorder %s2294_s1, %s2154_s19  ;;  %p2158_p1 = scmp.lt.u32.totalorder %s2154_s19, %s2294_s1 }
   0x4   :  { %p2160_p2 = pnand %p2158_p1, %p2155_p0 }
   0x6   :  { %2163 = shalt.err (!%p2160_p2)
}
   0x7   :  { %s2164_s24 = scalar_lea.vmem %s18_s16, 16384  ;;  %p2169_p4 = scmp.lt.s32.totalorder %s18_s16, %s18_s16 }
   0x8   :  { %p2165_p3 = scmp.ne.s32.totalorder %s18_s16, %s2164_s24  ;;  %p2170_p5 = scmp.lt.s32.totalorder %s2164_s24, %s2164_s24 }
   0xa   :  { %p2171_p6 = por %p2170_p5, %p2169_p4 }
   0xc   :  { %p2172_p7 = pnand %p2171_p6, %p2165_p3 }
   0xe   :  { %2175 = shalt.err (!%p2172_p7)
}
   0xf   :  { %s2179_s25 = smov 64   ;;  %s2180_s26 = smov 4  }
  0x10   :  { %23 = dma.hbm_to_vmem [thread:$0]  %s2294_s1, 16384, %s18_s16, [#allocation3], %s2179_s25, %s2179_s25, %s2180_s26  }
  0x11   :  { %2176 = dma.done.wait [#allocation3], 16384  }
  0x12   :  { %2177 = vsyncadd [#allocation3], 4294950912  ;;  %v1996_v0 = vld [vmem:[#allocation2 + $0x40] sm:$0xff]   ;;  %v2000_v4 = vld [vmem:[#allocation2 + $0x48] sm:$0xff]   ;;  %vm2182_vm0 = vmmov 0  }
  0x13   :  { %v1997_v1 = vld [vmem:[#allocation2 + $0xc0] sm:$0xff]   ;;  %1786 = vmatprep.subr.bf16.mxu0 %v1996_v0  ;;  %v2001_v5 = vld [vmem:[#allocation2 + $0xc8] sm:$0xff]   ;;  %v2004_v8 = vld [vmem:[#allocation2 + $0x50] sm:$0xff]  }
  0x14   :  { %v1998_v2 = vld [vmem:[#allocation2] sm:$0xff]   ;;  %1808 = vmatprep.subr.bf16.mxu1 %v1997_v1  ;;  %v2002_v6 = vld [vmem:[#allocation2 + $0x8] sm:$0xff]   ;;  %v2005_v9 = vld [vmem:[#allocation2 + $0xd0] sm:$0xff]  }
  0x15   :  { %v1999_v3 = vld [vmem:[#allocation2 + $0x80] sm:$0xff]   ;;  %1787 = vmatpush3.bf16.msra.mxu0 %v1998_v2  ;;  %v2003_v7 = vld [vmem:[#allocation2 + $0x88] sm:$0xff]   ;;  %v2006_v10 = vld [vmem:[#allocation2 + $0x10] sm:$0xff]  }
  0x16   :  { %1809 = vmatpush3.bf16.msra.mxu1 %v1999_v3  ;;  %1788 = vmatprep.subr.bf16.mxu0 %v2000_v4  ;;  %v2007_v11 = vld [vmem:[#allocation2 + $0x90] sm:$0xff]   ;;  %v2008_v12 = vld [vmem:[#allocation2 + $0x58] sm:$0xff]   ;;  %v2012_v16 = vld [vmem:[#allocation2 + $0x60] sm:$0xff]  }
  0x17   :  { %1810 = vmatprep.subr.bf16.mxu1 %v2001_v5  ;;  %v2009_v13 = vld [vmem:[#allocation2 + $0xd8] sm:$0xff]   ;;  %v2013_v17 = vld [vmem:[#allocation2 + $0xe0] sm:$0xff]   ;;  %v2016_v20 = vld [vmem:[#allocation2 + $0x68] sm:$0xff]  }
  0x18   :  { %v2010_v14 = vld [vmem:[#allocation2 + $0x18] sm:$0xff]   ;;  %v2014_v18 = vld [vmem:[#allocation2 + $0x20] sm:$0xff]   ;;  %v2017_v21 = vld [vmem:[#allocation2 + $0xe8] sm:$0xff]  }
  0x19   :  { %1789 = vmatpush3.bf16.msra.mxu0 %v2002_v6  ;;  %v2011_v15 = vld [vmem:[#allocation2 + $0x98] sm:$0xff]   ;;  %v2015_v19 = vld [vmem:[#allocation2 + $0xa0] sm:$0xff]   ;;  %v2018_v22 = vld [vmem:[#allocation2 + $0x28] sm:$0xff]  }
  0x1a   :  { %1811 = vmatpush3.bf16.msra.mxu1 %v2003_v7  ;;  %1790 = vmatprep.subr.bf16.mxu0 %v2004_v8  ;;  %v2019_v23 = vld [vmem:[#allocation2 + $0xa8] sm:$0xff]   ;;  %v2020_v24 = vld [vmem:[#allocation2 + $0x70] sm:$0xff]   ;;  %v2024_v28 = vld [vmem:[#allocation2 + $0x78] sm:$0xff]  }
  0x1b   :  { %1812 = vmatprep.subr.bf16.mxu1 %v2005_v9  ;;  %v2021_v25 = vld [vmem:[#allocation2 + $0xf0] sm:$0xff]   ;;  %v2025_v29 = vld [vmem:[#allocation2 + $0xf8] sm:$0xff]   ;;  %v36_v32 = vld [vmem:[%s2293_s0] sm:$0xff] }
  0x1c   :  { %v2022_v26 = vld [vmem:[#allocation2 + $0x30] sm:$0xff]   ;;  %v2026_v30 = vld [vmem:[#allocation2 + $0x38] sm:$0xff]   ;;  %v37_v33 = vld [vmem:[%s2293_s0 + $0x8] sm:$0xff]  ;;  %v1629_v34 = vcombine.low %v36_v32, %v36_v32  ;;  %v1630_v35 = vcombine.high %v36_v32, %v36_v32 }
  0x1d   :  { %1791 = vmatpush3.bf16.msra.mxu0 %v2006_v10  ;;  %v2023_v27 = vld [vmem:[#allocation2 + $0xb0] sm:$0xff]   ;;  %v2027_v31 = vld [vmem:[#allocation2 + $0xb8] sm:$0xff]   ;;  %v1631_v36 = vcombine.low %v37_v33, %v37_v33  ;;  %v1632_v37 = vcombine.high %v37_v33, %v37_v33  ;;  %v2032_v38 = vld [vmem:[#allocation2 + $0x140] sm:$0xff]  }
  0x1e   :  { %1813 = vmatpush3.bf16.msra.mxu1 %v2007_v11  ;;  %1792 = vmatprep.subr.bf16.mxu0 %v2008_v12  ;;  %v2033_v39 = vld [vmem:[#allocation2 + $0x1c0] sm:$0xff]   ;;  %v2036_v42 = vld [vmem:[#allocation2 + $0x148] sm:$0xff]   ;;  %v2040_v46 = vld [vmem:[#allocation2 + $0x150] sm:$0xff]  }
  0x1f   :  { %1814 = vmatprep.subr.bf16.mxu1 %v2009_v13  ;;  %1156 = vmatprep.mubr.bf16.mxu0 %v1630_v35  ;;  %v2034_v40 = vld [vmem:[#allocation2 + $0x100] sm:$0xff]   ;;  %v2037_v43 = vld [vmem:[#allocation2 + $0x1c8] sm:$0xff]   ;;  %v2041_v47 = vld [vmem:[#allocation2 + $0x1d0] sm:$0xff]  }
  0x20   :  { %1196 = vmatprep.mubr.bf16.mxu1 %v1632_v37  ;;  %v2035_v41 = vld [vmem:[#allocation2 + $0x180] sm:$0xff]   ;;  %v2038_v44 = vld [vmem:[#allocation2 + $0x108] sm:$0xff]   ;;  %v2042_v48 = vld [vmem:[#allocation2 + $0x110] sm:$0xff]  }
  0x21   :  { %1793 = vmatpush3.bf16.msra.mxu0 %v2010_v14  ;;  %v2039_v45 = vld [vmem:[#allocation2 + $0x188] sm:$0xff]   ;;  %v2043_v49 = vld [vmem:[#allocation2 + $0x190] sm:$0xff]   ;;  %v2044_v50 = vld [vmem:[#allocation2 + $0x158] sm:$0xff]  }
  0x22   :  { %1815 = vmatpush3.bf16.msra.mxu1 %v2011_v15  ;;  %1794 = vmatprep.subr.bf16.mxu0 %v2012_v16  ;;  %v2045_v51 = vld [vmem:[#allocation2 + $0x1d8] sm:$0xff]   ;;  %v2048_v54 = vld [vmem:[#allocation2 + $0x160] sm:$0xff]   ;;  %v2052_v58 = vld [vmem:[#allocation2 + $0x168] sm:$0xff]  }
  0x23   :  { %1816 = vmatprep.subr.bf16.mxu1 %v2013_v17  ;;  %v2046_v52 = vld [vmem:[#allocation2 + $0x118] sm:$0xff]   ;;  %v2049_v55 = vld [vmem:[#allocation2 + $0x1e0] sm:$0xff]   ;;  %v2053_v59 = vld [vmem:[#allocation2 + $0x1e8] sm:$0xff]  }
  0x24   :  { %v2047_v53 = vld [vmem:[#allocation2 + $0x198] sm:$0xff]   ;;  %v2050_v56 = vld [vmem:[#allocation2 + $0x120] sm:$0xff]   ;;  %v2054_v60 = vld [vmem:[#allocation2 + $0x128] sm:$0xff]  }
  0x25   :  { %1795 = vmatpush3.bf16.msra.mxu0 %v2014_v18  ;;  %v2051_v57 = vld [vmem:[#allocation2 + $0x1a0] sm:$0xff]   ;;  %v2055_v61 = vld [vmem:[#allocation2 + $0x1a8] sm:$0xff]   ;;  %v2056_v62 = vld [vmem:[#allocation2 + $0x170] sm:$0xff]  }
  0x26   :  { %1817 = vmatpush3.bf16.msra.mxu1 %v2015_v19  ;;  %1796 = vmatprep.subr.bf16.mxu0 %v2016_v20  ;;  %v2057_v63 = vld [vmem:[#allocation2 + $0x1f0] sm:$0xff]   ;;  %v2060_v2 = vld [vmem:[#allocation2 + $0x178] sm:$0xff]   ;;  %v2068_v12 = vld [vmem:[#allocation2 + $0x240] sm:$0xff]  }
  0x27   :  { %1818 = vmatprep.subr.bf16.mxu1 %v2017_v21  ;;  %v2058_v0 = vld [vmem:[#allocation2 + $0x130] sm:$0xff]   ;;  %v2061_v3 = vld [vmem:[#allocation2 + $0x1f8] sm:$0xff]   ;;  %v2069_v13 = vld [vmem:[#allocation2 + $0x2c0] sm:$0xff]  }
  0x28   :  { %v2059_v1 = vld [vmem:[#allocation2 + $0x1b0] sm:$0xff]   ;;  %v2062_v4 = vld [vmem:[#allocation2 + $0x138] sm:$0xff]   ;;  %v2070_v14 = vld [vmem:[#allocation2 + $0x200] sm:$0xff]  }
  0x29   :  { %1797 = vmatpush3.bf16.msra.mxu0 %v2018_v22  ;;  %v2063_v5 = vld [vmem:[#allocation2 + $0x1b8] sm:$0xff]   ;;  %v38_v6 = vld [vmem:[%s2293_s0 + $0x10] sm:$0xff]  ;;  %v2071_v15 = vld [vmem:[#allocation2 + $0x280] sm:$0xff]  }
  0x2a   :  { %1819 = vmatpush3.bf16.msra.mxu1 %v2019_v23  ;;  %1798 = vmatprep.subr.bf16.mxu0 %v2020_v24  ;;  %v1633_v7 = vcombine.low %v38_v6, %v38_v6  ;;  %v1634_v8 = vcombine.high %v38_v6, %v38_v6  ;;  %v39_v9 = vld [vmem:[%s2293_s0 + $0x18] sm:$0xff]  ;;  %v2072_v16 = vld [vmem:[#allocation2 + $0x248] sm:$0xff]   ;;  %v2076_v20 = vld [vmem:[#allocation2 + $0x250] sm:$0xff]  }
  0x2b   :  { %1820 = vmatprep.subr.bf16.mxu1 %v2021_v25  ;;  %v1635_v10 = vcombine.low %v39_v9, %v39_v9  ;;  %v1636_v11 = vcombine.high %v39_v9, %v39_v9  ;;  %v2073_v17 = vld [vmem:[#allocation2 + $0x2c8] sm:$0xff]   ;;  %v2077_v21 = vld [vmem:[#allocation2 + $0x2d0] sm:$0xff]   ;;  %v2080_v24 = vld [vmem:[#allocation2 + $0x258] sm:$0xff]  }
  0x2c   :  { %v2074_v18 = vld [vmem:[#allocation2 + $0x208] sm:$0xff]   ;;  %v2078_v22 = vld [vmem:[#allocation2 + $0x210] sm:$0xff]   ;;  %v2081_v25 = vld [vmem:[#allocation2 + $0x2d8] sm:$0xff]  }
  0x2d   :  { %1799 = vmatpush3.bf16.msra.mxu0 %v2022_v26  ;;  %v2075_v19 = vld [vmem:[#allocation2 + $0x288] sm:$0xff]   ;;  %v2079_v23 = vld [vmem:[#allocation2 + $0x290] sm:$0xff]   ;;  %v2082_v26 = vld [vmem:[#allocation2 + $0x218] sm:$0xff]  }
  0x2e   :  { %1821 = vmatpush3.bf16.msra.mxu1 %v2023_v27  ;;  %1800 = vmatprep.subr.bf16.mxu0 %v2024_v28  ;;  %v2083_v27 = vld [vmem:[#allocation2 + $0x298] sm:$0xff]   ;;  %v2084_v28 = vld [vmem:[#allocation2 + $0x260] sm:$0xff]   ;;  %v2088_v32 = vld [vmem:[#allocation2 + $0x268] sm:$0xff]  }
  0x2f   :  { %1822 = vmatprep.subr.bf16.mxu1 %v2025_v29  ;;  %v2085_v29 = vld [vmem:[#allocation2 + $0x2e0] sm:$0xff]   ;;  %v2089_v33 = vld [vmem:[#allocation2 + $0x2e8] sm:$0xff]   ;;  %v2093_v37 = vld [vmem:[#allocation2 + $0x2f0] sm:$0xff]  }
  0x30   :  { %v2091_v35 = vld [vmem:[#allocation2 + $0x2a8] sm:$0xff]  }
  0x31   :  { %1801 = vmatpush3.bf16.msra.mxu0 %v2026_v30  ;;  %v2086_v30 = vld [vmem:[#allocation2 + $0x220] sm:$0xff]   ;;  %v2124_v6 = vld [vmem:[#allocation2 + $0x368] sm:$0xff]  }
  0x32   :  { %1823 = vmatpush3.bf16.msra.mxu1 %v2027_v31  ;;  %1830 = vmatprep.subr.bf16.mxu0 %v2032_v38  ;;  %v2087_v31 = vld [vmem:[#allocation2 + $0x2a0] sm:$0xff]   ;;  %v2094_v38 = vld [vmem:[#allocation2 + $0x230] sm:$0xff]   ;;  %v2127_v9 = vld [vmem:[#allocation2 + $0x3a8] sm:$0xff]  }
  0x33   :  { %1852 = vmatprep.subr.bf16.mxu1 %v2033_v39  ;;  %v2095_v39 = vld [vmem:[#allocation2 + $0x2b0] sm:$0xff]  }
  0x34   :  { %1157 = vmatmul.mubr.bf16.vlgmr.msra.gmra.mrb[0].mxu0 %v1629_v34  ;;  %v2090_v34 = vld [vmem:[#allocation2 + $0x228] sm:$0xff]  }
  0x35   :  { %1197 = vmatmul.mubr.bf16.vlgmr.msra.gmra.mrb[0].mxu1 %v1631_v36  ;;  %1831 = vmatpush3.bf16.msra.mxu0 %v2034_v40  ;;  %v2092_v36 = vld [vmem:[#allocation2 + $0x270] sm:$0xff]   ;;  %v2096_v40 = vld [vmem:[#allocation2 + $0x278] sm:$0xff]  }
  0x36   :  { %1853 = vmatpush3.bf16.msra.mxu1 %v2035_v41  ;;  %1832 = vmatprep.subr.bf16.mxu0 %v2036_v42  ;;  %v2097_v41 = vld [vmem:[#allocation2 + $0x2f8] sm:$0xff]  }
  0x37   :  { %1854 = vmatprep.subr.bf16.mxu1 %v2037_v43  ;;  %1236 = vmatprep.mubr.bf16.mxu0 %v1634_v8  ;;  %v2098_v42 = vld [vmem:[#allocation2 + $0x238] sm:$0xff]   ;;  %v2126_v8 = vld [vmem:[#allocation2 + $0x328] sm:$0xff]  }
  0x38   :  { %1276 = vmatprep.mubr.bf16.mxu1 %v1636_v11  ;;  %v2099_v43 = vld [vmem:[#allocation2 + $0x2b8] sm:$0xff]   ;;  %v2129_v11 = vld [vmem:[#allocation2 + $0x3f0] sm:$0xff]  }
  0x39   :  { %1833 = vmatpush3.bf16.msra.mxu0 %v2038_v44  ;;  %v40_v44 = vld [vmem:[%s2293_s0 + $0x20] sm:$0xff] }
  0x3a   :  { %1855 = vmatpush3.bf16.msra.mxu1 %v2039_v45  ;;  %1834 = vmatprep.subr.bf16.mxu0 %v2040_v46  ;;  %v41_v45 = vld [vmem:[%s2293_s0 + $0x28] sm:$0xff]  ;;  %v1637_v46 = vcombine.low %v40_v44, %v40_v44 }
  0x3b   :  { %1856 = vmatprep.subr.bf16.mxu1 %v2041_v47  ;;  %v1638_v47 = vcombine.high %v40_v44, %v40_v44 }
  0x3d   :  { %1835 = vmatpush3.bf16.msra.mxu0 %v2042_v48  ;;  %v1639_v48 = vcombine.low %v41_v45, %v41_v45 }
  0x3e   :  { %1857 = vmatpush3.bf16.msra.mxu1 %v2043_v49  ;;  %1836 = vmatprep.subr.bf16.mxu0 %v2044_v50  ;;  %v1640_v49 = vcombine.high %v41_v45, %v41_v45  ;;  %v2104_v50 = vld [vmem:[#allocation2 + $0x340] sm:$0xff]  }
  0x3f   :  { %1858 = vmatprep.subr.bf16.mxu1 %v2045_v51  ;;  %v2105_v51 = vld [vmem:[#allocation2 + $0x3c0] sm:$0xff]  }
  0x41   :  { %1837 = vmatpush3.bf16.msra.mxu0 %v2046_v52  ;;  %v2106_v52 = vld [vmem:[#allocation2 + $0x300] sm:$0xff]  }
  0x42   :  { %1859 = vmatpush3.bf16.msra.mxu1 %v2047_v53  ;;  %1838 = vmatprep.subr.bf16.mxu0 %v2048_v54  ;;  %v2107_v53 = vld [vmem:[#allocation2 + $0x380] sm:$0xff]   ;;  %v2108_v54 = vld [vmem:[#allocation2 + $0x348] sm:$0xff]  }
  0x43   :  { %1860 = vmatprep.subr.bf16.mxu1 %v2049_v55  ;;  %v2109_v55 = vld [vmem:[#allocation2 + $0x3c8] sm:$0xff]  }
  0x45   :  { %1839 = vmatpush3.bf16.msra.mxu0 %v2050_v56  ;;  %v2110_v56 = vld [vmem:[#allocation2 + $0x308] sm:$0xff]  }
  0x46   :  { %1861 = vmatpush3.bf16.msra.mxu1 %v2051_v57  ;;  %1840 = vmatprep.subr.bf16.mxu0 %v2052_v58  ;;  %v2111_v57 = vld [vmem:[#allocation2 + $0x388] sm:$0xff]   ;;  %v2112_v58 = vld [vmem:[#allocation2 + $0x350] sm:$0xff]  }
  0x47   :  { %1862 = vmatprep.subr.bf16.mxu1 %v2053_v59  ;;  %v2113_v59 = vld [vmem:[#allocation2 + $0x3d0] sm:$0xff]  }
  0x49   :  { %1841 = vmatpush3.bf16.msra.mxu0 %v2054_v60  ;;  %v2114_v60 = vld [vmem:[#allocation2 + $0x310] sm:$0xff]  }
  0x4a   :  { %1863 = vmatpush3.bf16.msra.mxu1 %v2055_v61  ;;  %1842 = vmatprep.subr.bf16.mxu0 %v2056_v62  ;;  %v2115_v61 = vld [vmem:[#allocation2 + $0x390] sm:$0xff]   ;;  %v2116_v62 = vld [vmem:[#allocation2 + $0x358] sm:$0xff]  }
  0x4b   :  { %1864 = vmatprep.subr.bf16.mxu1 %v2057_v63  ;;  %v2117_v63 = vld [vmem:[#allocation2 + $0x3d8] sm:$0xff]  }
  0x4d   :  { %1843 = vmatpush3.bf16.msra.mxu0 %v2058_v0  ;;  %v2118_v0 = vld [vmem:[#allocation2 + $0x318] sm:$0xff]  }
  0x4e   :  { %1865 = vmatpush3.bf16.msra.mxu1 %v2059_v1  ;;  %1844 = vmatprep.subr.bf16.mxu0 %v2060_v2  ;;  %v2119_v1 = vld [vmem:[#allocation2 + $0x398] sm:$0xff]   ;;  %v2120_v2 = vld [vmem:[#allocation2 + $0x360] sm:$0xff]  }
  0x4f   :  { %1866 = vmatprep.subr.bf16.mxu1 %v2061_v3  ;;  %v2121_v3 = vld [vmem:[#allocation2 + $0x3e0] sm:$0xff]  }
  0x51   :  { %1845 = vmatpush3.bf16.msra.mxu0 %v2062_v4  ;;  %v2122_v4 = vld [vmem:[#allocation2 + $0x320] sm:$0xff]  }
  0x52   :  { %1867 = vmatpush3.bf16.msra.mxu1 %v2063_v5  ;;  %1874 = vmatprep.subr.bf16.mxu0 %v2068_v12  ;;  %v2123_v5 = vld [vmem:[#allocation2 + $0x3a0] sm:$0xff]   ;;  %v2130_v12 = vld [vmem:[#allocation2 + $0x330] sm:$0xff]  }
  0x53   :  { %1896 = vmatprep.subr.bf16.mxu1 %v2069_v13  ;;  %v2131_v13 = vld [vmem:[#allocation2 + $0x3b0] sm:$0xff]  }
  0x54   :  { %1237 = vmatmul.mubr.bf16.vlgmr.msra.gmra.mrb[4].mxu0 %v1633_v7  ;;  %v2125_v7 = vld [vmem:[#allocation2 + $0x3e8] sm:$0xff]  }
  0x55   :  { %1277 = vmatmul.mubr.bf16.vlgmr.msra.gmra.mrb[4].mxu1 %v1635_v10  ;;  %1875 = vmatpush3.bf16.msra.mxu0 %v2070_v14  ;;  %v2128_v10 = vld [vmem:[#allocation2 + $0x370] sm:$0xff]   ;;  %v2132_v14 = vld [vmem:[#allocation2 + $0x378] sm:$0xff]  }
  0x56   :  { %1897 = vmatpush3.bf16.msra.mxu1 %v2071_v15  ;;  %1876 = vmatprep.subr.bf16.mxu0 %v2072_v16  ;;  %v2133_v15 = vld [vmem:[#allocation2 + $0x3f8] sm:$0xff]  }
  0x57   :  { %1898 = vmatprep.subr.bf16.mxu1 %v2073_v17  ;;  %1316 = vmatprep.mubr.bf16.mxu0 %v1638_v47  ;;  %v2134_v16 = vld [vmem:[#allocation2 + $0x338] sm:$0xff]  }
  0x58   :  { %1356 = vmatprep.mubr.bf16.mxu1 %v1640_v49  ;;  %v2135_v17 = vld [vmem:[#allocation2 + $0x3b8] sm:$0xff]  }
  0x59   :  { %1877 = vmatpush3.bf16.msra.mxu0 %v2074_v18  ;;  %v42_v18 = vld [vmem:[%s2293_s0 + $0x30] sm:$0xff] }
  0x5a   :  { %1899 = vmatpush3.bf16.msra.mxu1 %v2075_v19  ;;  %1878 = vmatprep.subr.bf16.mxu0 %v2076_v20  ;;  %v43_v19 = vld [vmem:[%s2293_s0 + $0x38] sm:$0xff]  ;;  %v1641_v20 = vcombine.low %v42_v18, %v42_v18 }
  0x5b   :  { %1900 = vmatprep.subr.bf16.mxu1 %v2077_v21  ;;  %v1642_v21 = vcombine.high %v42_v18, %v42_v18 }
  0x5d   :  { %1879 = vmatpush3.bf16.msra.mxu0 %v2078_v22  ;;  %v1643_v22 = vcombine.low %v43_v19, %v43_v19 }
  0x5e   :  { %1901 = vmatpush3.bf16.msra.mxu1 %v2079_v23  ;;  %1880 = vmatprep.subr.bf16.mxu0 %v2080_v24  ;;  %v1644_v23 = vcombine.high %v43_v19, %v43_v19  ;;  %v2181_v24 = vmov 0.0  }
  0x5f   :  { %1902 = vmatprep.subr.bf16.mxu1 %v2081_v25 }
  0x61   :  { %1881 = vmatpush3.bf16.msra.mxu0 %v2082_v26 }
  0x62   :  { %1903 = vmatpush3.bf16.msra.mxu1 %v2083_v27  ;;  %1882 = vmatprep.subr.bf16.mxu0 %v2084_v28 }
  0x63   :  { %1904 = vmatprep.subr.bf16.mxu1 %v2085_v29 }
  0x65   :  { %1883 = vmatpush3.bf16.msra.mxu0 %v2086_v30 }
  0x66   :  { %1905 = vmatpush3.bf16.msra.mxu1 %v2087_v31  ;;  %1884 = vmatprep.subr.bf16.mxu0 %v2088_v32 }
  0x67   :  { %1906 = vmatprep.subr.bf16.mxu1 %v2089_v33 }
  0x69   :  { %1885 = vmatpush3.bf16.msra.mxu0 %v2090_v34 }
  0x6a   :  { %1907 = vmatpush3.bf16.msra.mxu1 %v2091_v35  ;;  %1886 = vmatprep.subr.bf16.mxu0 %v2092_v36  ;;  %v2140_v36 = vld [vmem:[%s2295_s2] sm:$0xff]  }
  0x6b   :  { %1908 = vmatprep.subr.bf16.mxu1 %v2093_v37  ;;  %v2141_v37 = vld [vmem:[%s2295_s2 + $0x8] sm:$0xff]  }
  0x6d   :  { %1887 = vmatpush3.bf16.msra.mxu0 %v2094_v38  ;;  %v2142_v38 = vld [vmem:[%s2295_s2 + $0x10] sm:$0xff]  }
  0x6e   :  { %1909 = vmatpush3.bf16.msra.mxu1 %v2095_v39  ;;  %1888 = vmatprep.subr.bf16.mxu0 %v2096_v40  ;;  %v2143_v39 = vld [vmem:[%s2295_s2 + $0x18] sm:$0xff]   ;;  %v2144_v40 = vld [vmem:[%s2295_s2 + $0x20] sm:$0xff]  }
  0x6f   :  { %1910 = vmatprep.subr.bf16.mxu1 %v2097_v41  ;;  %v2145_v41 = vld [vmem:[%s2295_s2 + $0x28] sm:$0xff]  }
  0x71   :  { %1889 = vmatpush3.bf16.msra.mxu0 %v2098_v42  ;;  %v2146_v42 = vld [vmem:[%s2295_s2 + $0x30] sm:$0xff]  }
  0x72   :  { %1911 = vmatpush3.bf16.msra.mxu1 %v2099_v43  ;;  %1918 = vmatprep.subr.bf16.mxu0 %v2104_v50  ;;  %v2147_v43 = vld [vmem:[%s2295_s2 + $0x38] sm:$0xff]  }
  0x73   :  { %1940 = vmatprep.subr.bf16.mxu1 %v2105_v51 }
  0x74   :  { %1317 = vmatmul.mubr.bf16.vlgmr.msra.gmra.mrb[8].mxu0 %v1637_v46 }
  0x75   :  { %1357 = vmatmul.mubr.bf16.vlgmr.msra.gmra.mrb[8].mxu1 %v1639_v48  ;;  %1919 = vmatpush3.bf16.msra.mxu0 %v2106_v52 }
  0x76   :  { %1941 = vmatpush3.bf16.msra.mxu1 %v2107_v53  ;;  %1920 = vmatprep.subr.bf16.mxu0 %v2108_v54 }
  0x77   :  { %1942 = vmatprep.subr.bf16.mxu1 %v2109_v55  ;;  %1396 = vmatprep.mubr.bf16.mxu0 %v1642_v21 }
  0x78   :  { %1436 = vmatprep.mubr.bf16.mxu1 %v1644_v23 }
  0x79   :  { %1921 = vmatpush3.bf16.msra.mxu0 %v2110_v56 }
  0x7a   :  { %1943 = vmatpush3.bf16.msra.mxu1 %v2111_v57  ;;  %1922 = vmatprep.subr.bf16.mxu0 %v2112_v58 }
  0x7b   :  { %1944 = vmatprep.subr.bf16.mxu1 %v2113_v59 }
  0x7d   :  { %1923 = vmatpush3.bf16.msra.mxu0 %v2114_v60 }
  0x7e   :  { %1945 = vmatpush3.bf16.msra.mxu1 %v2115_v61  ;;  %1924 = vmatprep.subr.bf16.mxu0 %v2116_v62 }
  0x7f   :  { %1946 = vmatprep.subr.bf16.mxu1 %v2117_v63 }
  0x81   :  { %1925 = vmatpush3.bf16.msra.mxu0 %v2118_v0 }
  0x82   :  { %1947 = vmatpush3.bf16.msra.mxu1 %v2119_v1  ;;  %1926 = vmatprep.subr.bf16.mxu0 %v2120_v2 }
  0x83   :  { %1948 = vmatprep.subr.bf16.mxu1 %v2121_v3 }
  0x85   :  { %1927 = vmatpush3.bf16.msra.mxu0 %v2122_v4  ;;  %v1444_v4 = vlaneseq }
  0x86   :  { %1949 = vmatpush3.bf16.msra.mxu1 %v2123_v5  ;;  %1928 = vmatprep.subr.bf16.mxu0 %v2124_v6 }
  0x87   :  { %1950 = vmatprep.subr.bf16.mxu1 %v2125_v7  ;;  %v1445_v5 = vshrl.u32 %v1444_v4, 7 }
  0x89   :  { %1929 = vmatpush3.bf16.msra.mxu0 %v2126_v8  ;;  %vm1446_vm1 = vcmp.lt.s32.totalorder %v1445_v5, 2 }
  0x8a   :  { %1951 = vmatpush3.bf16.msra.mxu1 %v2127_v9  ;;  %1930 = vmatprep.subr.bf16.mxu0 %v2128_v10 }
  0x8b   :  { %1952 = vmatprep.subr.bf16.mxu1 %v2129_v11 }
  0x8d   :  { %1931 = vmatpush3.bf16.msra.mxu0 %v2130_v12 }
  0x8e   :  { %1953 = vmatpush3.bf16.msra.mxu1 %v2131_v13  ;;  %1932 = vmatprep.subr.bf16.mxu0 %v2132_v14 }
  0x8f   :  { %1954 = vmatprep.subr.bf16.mxu1 %v2133_v15 }
  0x91   :  { %1933 = vmatpush3.bf16.msra.mxu0 %v2134_v16 }
  0x92   :  { %1955 = vmatpush3.bf16.msra.mxu1 %v2135_v17  ;;  %1971 = vmatprep.subr.bf16.mxu0 %v2181_v24  ;;  %v1773_v17 = vsel %vm1446_vm1, 1.0, %v2181_v24 }
  0x94   :  { %1397 = vmatmul.mubr.bf16.vlgmr.msra.gmra.mrb[12].mxu0 %v1641_v20 }
  0x95   :  { %1437 = vmatmul.mubr.bf16.vlgmr.msra.gmra.mrb[12].mxu1 %v1643_v22  ;;  %1972 = vmatpush3.bf16.msra.mxu0 %v2140_v36 }
  0x96   :  { %1973 = vmatprep.subr.bf16.mxu0 %v2181_v24  ;;  %1987 = vmatprep.mubr.msk.bf16.mxu0 %vm2182_vm0, %v2181_v24 }
  0x99   :  { %1974 = vmatpush3.bf16.msra.mxu0 %v2141_v37 }
  0x9a   :  { %1975 = vmatprep.subr.bf16.mxu0 %v2181_v24 }
  0x9d   :  { %1976 = vmatpush3.bf16.msra.mxu0 %v2142_v38 }
  0x9e   :  { %1977 = vmatprep.subr.bf16.mxu0 %v2181_v24 }
  0xa1   :  { %1978 = vmatpush3.bf16.msra.mxu0 %v2143_v39  ;;  %v1774_v39 = vld [vmem:[%s2296_s3] ss:$0 sm:$0xff] }
  0xa2   :  { %1979 = vmatprep.subr.bf16.mxu0 %v2181_v24 }
  0xa5   :  { %1980 = vmatpush3.bf16.msra.mxu0 %v2144_v40 }
  0xa6   :  { %1981 = vmatprep.subr.bf16.mxu0 %v2181_v24 }
  0xa9   :  { %1982 = vmatpush3.bf16.msra.mxu0 %v2145_v41  ;;  %v1775_v41 = vld [vmem:[%s2296_s3 + $0x1] ss:$0 sm:$0xff] }
  0xaa   :  { %1983 = vmatprep.subr.bf16.mxu0 %v2181_v24 }
  0xad   :  { %1984 = vmatpush3.bf16.msra.mxu0 %v2146_v42 }
  0xae   :  { %1985 = vmatprep.subr.bf16.mxu0 %v2181_v24 }
  0xb1   :  { %1986 = vmatpush3.bf16.msra.mxu0 %v2147_v43 }
 0x107   :  { %v1802_v25 = vpop.f32.mrb[0].mxu0 }
 0x108   :  { %v1824_v26 = vpop.f32.mrb[0].mxu1  ;;  %v1803_v27 = vpop.f32.mrb[1].mxu0 }
 0x109   :  { %v1825_v28 = vpop.f32.mrb[1].mxu1  ;;  %v1804_v29 = vadd.f32 %v1803_v27, %v1802_v25  ;;  %v1805_v31 = vpop.f32.mrb[2].mxu0 }
 0x10a   :  { %v1826_v30 = vadd.f32 %v1825_v28, %v1824_v26  ;;  %v1827_v32 = vpop.f32.mrb[2].mxu1  ;;  %v1806_v33 = vpop.f32.mrb[3].mxu0 }
 0x10b   :  { %v1828_v34 = vpop.f32.mrb[3].mxu1 }
 0x10c   :  { %v1199_v35 = vadd.f32 %v1826_v30, %v1804_v29 }
 0x127   :  { %v1846_v44 = vpop.f32.mrb[4].mxu0 }
 0x128   :  { %v1868_v45 = vpop.f32.mrb[4].mxu1  ;;  %v1847_v46 = vpop.f32.mrb[5].mxu0 }
 0x129   :  { %v1869_v47 = vpop.f32.mrb[5].mxu1  ;;  %v1848_v48 = vadd.f32 %v1847_v46, %v1846_v44  ;;  %v1849_v50 = vpop.f32.mrb[6].mxu0 }
 0x12a   :  { %v1870_v49 = vadd.f32 %v1869_v47, %v1868_v45  ;;  %v1871_v51 = vpop.f32.mrb[6].mxu1  ;;  %v1850_v52 = vpop.f32.mrb[7].mxu0 }
 0x12b   :  { %v1872_v53 = vpop.f32.mrb[7].mxu1  ;;  %v1239_v54 = vadd.f32 %v1848_v48, %v1199_v35 }
 0x12d   :  { %v1279_v55 = vadd.f32 %v1870_v49, %v1239_v54 }
 0x147   :  { %v1890_v56 = vpop.f32.mrb[8].mxu0 }
 0x148   :  { %v1912_v57 = vpop.f32.mrb[8].mxu1  ;;  %v1891_v58 = vpop.f32.mrb[9].mxu0 }
 0x149   :  { %v1892_v59 = vadd.f32 %v1891_v58, %v1890_v56  ;;  %v1913_v60 = vpop.f32.mrb[9].mxu1  ;;  %v1893_v61 = vpop.f32.mrb[10].mxu0 }
 0x14a   :  { %v1914_v62 = vadd.f32 %v1913_v60, %v1912_v57  ;;  %v1915_v63 = vpop.f32.mrb[10].mxu1  ;;  %v1894_v0 = vpop.f32.mrb[11].mxu0 }
 0x14b   :  { %v1319_v1 = vadd.f32 %v1892_v59, %v1279_v55  ;;  %v1916_v2 = vpop.f32.mrb[11].mxu1 }
 0x14d   :  { %v1359_v3 = vadd.f32 %v1914_v62, %v1319_v1 }
 0x167   :  { %v1934_v6 = vpop.f32.mrb[12].mxu0 }
 0x168   :  { %v1956_v7 = vpop.f32.mrb[12].mxu1  ;;  %v1935_v8 = vpop.f32.mrb[13].mxu0 }
 0x169   :  { %v1936_v9 = vadd.f32 %v1935_v8, %v1934_v6  ;;  %v1957_v10 = vpop.f32.mrb[13].mxu1  ;;  %v1937_v11 = vpop.f32.mrb[14].mxu0  ;;  %v1784_v6 = vld [vmem:[%s2296_s3 + $0x2] ss:$0 sm:$0xff]  ;;  %v1785_v8 = vld [vmem:[%s2296_s3 + $0x3] ss:$0 sm:$0xff] }
 0x16a   :  { %v1958_v12 = vadd.f32 %v1957_v10, %v1956_v7  ;;  %v1959_v13 = vpop.f32.mrb[14].mxu1  ;;  %v1938_v14 = vpop.f32.mrb[15].mxu0 }
 0x16b   :  { %v1399_v15 = vadd.f32 %v1936_v9, %v1359_v3  ;;  %v1960_v16 = vpop.f32.mrb[15].mxu1 }
 0x16d   :  { %v1439_v18 = vadd.f32 %v1958_v12, %v1399_v15 }
 0x16f   :  { %v1449_v19 = vmul.f32 %v1773_v17, %v1439_v18 }
 0x171   :  { %v1450_v20 = vrot.slane %v1449_v19, 4 }
 0x173   :  { %v1451_v21 = vadd.f32 %v1450_v20, %v1449_v19 }
 0x175   :  { %v1452_v22 = vrot.slane %v1451_v21, 2 }
 0x177   :  { %v1453_v23 = vadd.f32 %v1452_v22, %v1451_v21 }
 0x179   :  { %v1454_v25 = vrot.slane %v1453_v23, 1 }
 0x17b   :  { %v1455_v26 = vadd.f32 %v1454_v25, %v1453_v23 }
 0x17d   :  { %v1456_v27 = vmul.f32 0.5, %v1455_v26 }
 0x17f   :  { %v1457_v28 = vsub.f32 %v1439_v18, %v1456_v27 }
 0x181   :  { %v1458_v29 = vmul.f32 %v1773_v17, %v1457_v28 }
 0x183   :  { %v1459_v30 = vmul.f32 %v1458_v29, %v1458_v29 }
 0x185   :  { %v1460_v31 = vrot.slane %v1459_v30, 4 }
 0x187   :  { %v1461_v32 = vadd.f32 %v1460_v31, %v1459_v30 }
 0x189   :  { %v1462_v33 = vrot.slane %v1461_v32, 2 }
 0x18b   :  { %v1463_v34 = vadd.f32 %v1462_v33, %v1461_v32 }
 0x18d   :  { %v1464_v35 = vrot.slane %v1463_v34, 1 }
 0x18f   :  { %v1465_v36 = vadd.f32 %v1464_v35, %v1463_v34 }
 0x191   :  { %v1466_v37 = vmul.f32 0.5, %v1465_v36 }
 0x193   :  { %v1467_v24 = vadd.f32 1e-05, %v1466_v37 }
 0x195   :  { %2148 = vrsqrt.f32 %v1467_v24 }
 0x19f   :  { %v2149_v38 = vpop.eup %2148 }
 0x1a0   :  { %v1469_v40 = vmul.f32 %v2149_v38, %v1457_v28 }
 0x1a2   :  { %v1474_v42 = vmul.f32 %v1774_v39, %v1469_v40 }
 0x1a4   :  { %v1479_v43 = vadd.f32 %v1775_v41, %v1474_v42 }
 0x1a6   :  { %v1480_v44 = vmax.f32 %v1479_v43, 0.0 }
 0x1a8   :  { %v1481_v45 = vpack.c.bf16 %v1480_v44, %v1480_v44 }
 0x1aa   :  { %1988 = vmatmul.mubr.bf16.vlgmr.msra.gmra.mrb[16].mxu0 %v1481_v45 }
 0x27d   :  { %v1580_v46 = vpop.f32.mrb[16].mxu0 }
 0x27e   :  { %v1586_v47 = vmul.f32 %v1773_v17, %v1580_v46  ;;  %v1989_v48 = vpop.f32.mrb[17].mxu0 }
 0x27f   :  { %v1583_v49 = vpop.f32.mrb[18].mxu0 }
 0x280   :  { %v1587_v50 = vrot.slane %v1586_v47, 4  ;;  %v1990_v51 = vpop.f32.mrb[19].mxu0 }
 0x282   :  { %v1588_v52 = vadd.f32 %v1587_v50, %v1586_v47 }
 0x284   :  { %v1589_v53 = vrot.slane %v1588_v52, 2 }
 0x286   :  { %v1590_v54 = vadd.f32 %v1589_v53, %v1588_v52 }
 0x288   :  { %v1591_v55 = vrot.slane %v1590_v54, 1 }
 0x28a   :  { %v1592_v56 = vadd.f32 %v1591_v55, %v1590_v54 }
 0x28c   :  { %v1593_v57 = vmul.f32 0.5, %v1592_v56 }
 0x28e   :  { %v1594_v58 = vsub.f32 %v1580_v46, %v1593_v57 }
 0x290   :  { %v1595_v59 = vmul.f32 %v1773_v17, %v1594_v58 }
 0x292   :  { %v1596_v60 = vmul.f32 %v1595_v59, %v1595_v59 }
 0x294   :  { %v1597_v61 = vrot.slane %v1596_v60, 4 }
 0x296   :  { %v1598_v62 = vadd.f32 %v1597_v61, %v1596_v60 }
 0x298   :  { %v1599_v63 = vrot.slane %v1598_v62, 2 }
 0x29a   :  { %v1600_v0 = vadd.f32 %v1599_v63, %v1598_v62 }
 0x29c   :  { %v1601_v1 = vrot.slane %v1600_v0, 1 }
 0x29e   :  { %v1602_v2 = vadd.f32 %v1601_v1, %v1600_v0 }
 0x2a0   :  { %v1603_v3 = vmul.f32 0.5, %v1602_v2 }
 0x2a2   :  { %v1604_v4 = vadd.f32 1e-05, %v1603_v3 }
 0x2a4   :  { %2150 = vrsqrt.f32 %v1604_v4 }
 0x2ae   :  { %v2151_v5 = vpop.eup %2150 }
 0x2af   :  { %v1606_v7 = vmul.f32 %v2151_v5, %v1594_v58 }
 0x2b1   :  { %v1611_v9 = vmul.f32 %v1784_v6, %v1606_v7 }
 0x2b3   :  { %v1616_v10 = vadd.f32 %v1785_v8, %v1611_v9 }
 0x2b5   :  { %v1617_v11 = vmul.f32 %v1616_v10, %v1616_v10 }
 0x2b7   :  { %1618 = vadd.xlane.f32.xlu0 %v1617_v11 }
 0x344   :  { %v1619_v12 = vpop.xlane.xlu0 %1618 }
 0x345   :  { %v1620_v13 = vmax.f32 %v1619_v12, 1e-24 }
 0x347   :  { %2152 = vrsqrt.f32 %v1620_v13 }
 0x351   :  { %v2153_v14 = vpop.eup %2152 }
 0x352   :  { %v1622_v15 = vmul.f32 %v2153_v14, %v1616_v10 }
 0x354   :  { %1623 = vst [vmem:[%s2297_s4] sm:$0xff] %v1622_v15 }
 0x355   :  { %1628 = vsyncpa [#allocation3], 1 }

</bundles_post_ra>
